<compile_context>
chip_gen: v5e
topology: v5e:2x2
jax: 0.10.0
libtpu: 0.0.40
codegen_flags: <defaults>
</compile_context>

<pallas_src>
import math
import functools

import jax
import jax.numpy as jnp
from jax import lax
from jax.experimental import pallas as pl
from jax.experimental.pallas import tpu as pltpu


# ---------------------------------------------------------------------------
# Generation-aware hardware introspection.
# ---------------------------------------------------------------------------

def _tpu_hw_info():
    """Returns (physical VMEM bytes, TensorCores per chip, query-tile alignment)."""
    vmem_cap = 64 * 1024 * 1024          # conservative default (v7x has the least VMEM)
    try:
        vmem_cap = int(pltpu.get_tpu_info().vmem_capacity_bytes)
    except Exception:
        pass
    # sanitize
    vmem_cap = min(max(vmem_cap, 32 * 1024 * 1024), 128 * 1024 * 1024)

    n_cores, q_align = 1, 256
    try:
        kind = jax.devices()[0].device_kind.lower()
        if "v7" in kind or "7x" in kind:
            n_cores = 2                  # v7x: 2 TensorCores per chip
        if "v5 lite" in kind or "v5e" in kind or "v5lite" in kind:
            q_align = 128                # v5e MXU is 4x128x128: 128-aligned q tiles suffice
    except Exception:
        pass
    return vmem_cap, n_cores, q_align


def _per_slot_vmem_bytes(S, Tq, D, in_item, out_item, has_mask, mask_per_slot):
    """VMEM footprint of one (batch*head) slot for one grid step."""
    # Pallas double-buffers every input AND output block (x2).
    io = 2 * (Tq * D * in_item          # q block
              + 2 * S * D * in_item     # k + v blocks (resident across q tiles)
              + Tq * D * out_item       # out block
              + Tq * S * out_item)      # score output block
    if has_mask and mask_per_slot:
        io += 2 * Tq * S                # int8 per-slot mask block
    # f32 temps simultaneously live: score, e, p (+ m/l row stats).
    temps = 3 * Tq * S * 4 + 2 * Tq * 4
    return io + temps


def _choose_config(BH, S, D, in_item, out_item, has_mask, mask_per_slot):
    """Pick (bb, Tq, vmem_limit_bytes) for this problem on this TPU generation."""
    vmem_cap, n_cores, q_align = _tpu_hw_info()
    budget = int(vmem_cap * 0.45)        # block buffers target ~45% of physical VMEM
    vmem_limit = int(vmem_cap * 0.80)    # and grant the compiler most of the rest

    per_slot = functools.partial(
        _per_slot_vmem_bytes, S, D=D, in_item=in_item, out_item=out_item,
        has_mask=has_mask, mask_per_slot=mask_per_slot)

    # --- query tile (flash-style) so the f32 score block stays bounded at large S.
    if S > q_align and S % q_align == 0:
        cands = sorted({S} | {t for t in range(q_align, S, q_align) if S % t == 0},
                       reverse=True)
        Tq = cands[-1]
        for t in cands:                  # largest tile that still leaves room for bb >= 2
            if per_slot(t) <= budget // 2:
                Tq = t
                break
    else:
        Tq = S
    n_q = S // Tq

    # --- how many (batch*head) slots to pack per grid step.
    slot_bytes = max(per_slot(Tq), 1)
    cap = max(1, budget // slot_bytes)
    divisors = [d for d in range(1, BH + 1) if BH % d == 0 and d <= cap] or [1]
    if n_cores >= 2 and BH >= 2:
        # v7x only: keep both TensorCores busy — prefer an even total step count,
        # otherwise at least 2 steps. On 1-TC chips the grid is a serial loop, so
        # the largest bb (fewest steps) is best and no cap is applied.
        even = [d for d in divisors if ((BH // d) * n_q) % 2 == 0]
        multi = [d for d in divisors if (BH // d) * n_q >= 2]
        divisors = even or multi or divisors
    bb = max(divisors)
    return bb, Tq, vmem_limit


# ---------------------------------------------------------------------------
# Kernel.
# ---------------------------------------------------------------------------

def _attention_body(q_ref, k_ref, v_ref, m_ref, o_ref, s_ref):
    # Blocks: q/o are (bb, Tq, D); k/v are (bb, S, D); score is (bb, Tq, S);
    # mask (if any) is (1 | bb, Tq, S) int8 and broadcasts over the slot axis.
    d = q_ref.shape[-1]
    scale = jnp.asarray(1.0 / math.sqrt(d), dtype=q_ref.dtype)

    q = q_ref[...] * scale               # fold 1/sqrt(d) into the smaller operand
    k = k_ref[...]

    # score = (q / sqrt(d)) @ k^T — contract last dims (no explicit transpose),
    # native-dtype MXU operands, f32 accumulation.
    score = lax.dot_general(
        q, k,
        dimension_numbers=(((2,), (2,)), ((0,), (0,))),
        preferred_element_type=jnp.float32)            # (bb, Tq, S) f32

    if m_ref is not None:
        # masked_fill(mask == 0, -10000); int8 mask, broadcasts over slots.
        score = jnp.where(m_ref[...] == 0, jnp.float32(-10000.0), score)

    # Numerically-stable softmax. Exact reciprocal: l is only (bb, Tq, 1) so it
    # is cheap, and the returned probabilities stay exact (rows sum to ~1).
    m = jnp.max(score, axis=-1, keepdims=True)
    e = jnp.exp(score - m)
    l = jnp.sum(e, axis=-1, keepdims=True)
    p = e * (1.0 / l)

    v = v_ref[...]
    p_cast = p.astype(v.dtype)            # single O(Tq*S) cast, reused below

    # out = p @ v — native-dtype MXU operands, f32 accumulation.
    out = lax.dot_general(
        p_cast, v,
        dimension_numbers=(((2,), (1,)), ((0,), (0,))),
        preferred_element_type=jnp.float32)            # (bb, Tq, D) f32

    s_ref[...] = p_cast if s_ref.dtype == p_cast.dtype else p.astype(s_ref.dtype)
    o_ref[...] = out.astype(o_ref.dtype)


def _sdpa_kernel(q_ref, k_ref, v_ref, o_ref, s_ref):
    _attention_body(q_ref, k_ref, v_ref, None, o_ref, s_ref)


def _sdpa_masked_kernel(q_ref, k_ref, v_ref, m_ref, o_ref, s_ref):
    _attention_body(q_ref, k_ref, v_ref, m_ref, o_ref, s_ref)


# ---------------------------------------------------------------------------
# Wrapper.
# ---------------------------------------------------------------------------

@jax.jit
def scale_dot_product_attention(q, k, v, mask=None):
    """Pallas implementation of ScaleDotProductAttention.forward.

    q, k, v: [B, H, S, D]; mask: optional, right-aligned broadcastable to
    [B, H, S, S] (positions where mask == 0 get -10000 before softmax).
    returns: (out [B, H, S, D], score [B, H, S, S])
    """
    B, H, S, D = q.shape
    BH = B * H
    qf = q.reshape(BH, S, D)
    kf = k.reshape(BH, S, D)
    vf = v.reshape(BH, S, D)

    in_item = q.dtype.itemsize
    out_item = q.dtype.itemsize

    # --- mask preprocessing (keep it int8; never materialize an f32 broadcast).
    mask_mode = None
    m_i8 = None
    if mask is not None:
        m_i8 = (jnp.asarray(mask) != 0).astype(jnp.int8)
        while m_i8.ndim < 4:
            m_i8 = m_i8[None]                  # right-aligned broadcast, like torch
        mb, mh = m_i8.shape[0], m_i8.shape[1]
        m_i8 = jnp.broadcast_to(m_i8, (mb, mh, S, S))
        if mb == 1 and mh == 1:
            mask_mode = "shared"               # one resident (1, S, S) tile
        elif mh == 1 and mb == B:
            mask_mode = "batch"                # per-batch, shared over heads
        else:
            mask_mode = "slot"                 # genuinely per-(batch, head)

    bb, Tq, vmem_limit = _choose_config(
        BH, S, D, in_item, out_item, mask is not None, mask_mode == "slot")
    n_bh, n_q = BH // bb, S // Tq
    grid = (n_bh, n_q)

    # "batch" mask mode needs every bb-slot block to live inside one batch.
    if mask_mode == "batch" and not (bb <= H and H % bb == 0):
        mask_mode = "slot"

    q_spec = pl.BlockSpec((bb, Tq, D), lambda ib, iq: (ib, iq, 0))
    kv_spec = pl.BlockSpec((bb, S, D), lambda ib, iq: (ib, 0, 0))   # resident over iq
    out_specs = [pl.BlockSpec((bb, Tq, D), lambda ib, iq: (ib, iq, 0)),
                 pl.BlockSpec((bb, Tq, S), lambda ib, iq: (ib, iq, 0))]
    out_shapes = (jax.ShapeDtypeStruct((BH, S, D), q.dtype),
                  jax.ShapeDtypeStruct((BH, S, S), q.dtype))

    in_specs = [q_spec, kv_spec, kv_spec]
    args = (qf, kf, vf)
    kernel = _sdpa_kernel
    mask_bytes = 0

    if mask_mode is not None:
        if mask_mode == "shared":
            mask_arg = m_i8.reshape(1, S, S)
            mask_spec = pl.BlockSpec((1, Tq, S), lambda ib, iq: (0, iq, 0))
        elif mask_mode == "batch":
            mask_arg = m_i8.reshape(B, S, S)
            mask_spec = pl.BlockSpec((1, Tq, S),
                                     lambda ib, iq: ((ib * bb) // H, iq, 0))
        else:  # per-slot
            mask_arg = jnp.broadcast_to(m_i8, (B, H, S, S)).reshape(BH, S, S)
            mask_spec = pl.BlockSpec((bb, Tq, S), lambda ib, iq: (ib, iq, 0))
        in_specs = in_specs + [mask_spec]
        args = args + (mask_arg,)
        kernel = _sdpa_masked_kernel
        mask_bytes = int(mask_arg.size)        # int8

    flops = 4 * BH * S * S * D + 6 * BH * S * S
    transcendentals = BH * S * S
    bytes_accessed = (3 * BH * S * D) * in_item \
        + (BH * S * D + BH * S * S) * out_item + mask_bytes

    compiler_params = pltpu.CompilerParams(
        dimension_semantics=("parallel", "parallel"),
        vmem_limit_bytes=vmem_limit)

    out, score = pl.pallas_call(
        kernel,
        out_shape=out_shapes,
        grid_spec=pltpu.PrefetchScalarGridSpec(
            num_scalar_prefetch=0,
            grid=grid,
            in_specs=in_specs,
            out_specs=out_specs),
        compiler_params=compiler_params,
        cost_estimate=pl.CostEstimate(
            flops=flops, transcendentals=transcendentals,
            bytes_accessed=bytes_accessed),
    )(*args)

    return out.reshape(B, H, S, D), score.reshape(B, H, S, S)


# ---------------------------------------------------------------------------
# Pure-JAX reference + self-test.
# ---------------------------------------------------------------------------

def _reference(q, k, v, mask=None):
    d = k.shape[-1]
    score = jnp.einsum("bhqd,bhkd->bhqk", q, k) / math.sqrt(d)
    if mask is not None:
        score = jnp.where(mask == 0, -10000.0, score)
    score = jax.nn.softmax(score, axis=-1)
    out = jnp.einsum("bhqk,bhkd->bhqd", score, v)
    return out, score


if __name__ == "__main__":
    # Small shapes consistent with the module's usage: batch=2, heads=4, seq=8, d=32.
    B, H, S, D = 2, 4, 8, 32
    key = jax.random.PRNGKey(0)
    kq, kk, kv = jax.random.split(key, 3)
    q = jax.random.normal(kq, (B, H, S, D), dtype=jnp.float32)
    k = jax.random.normal(kk, (B, H, S, D), dtype=jnp.float32)
    v = jax.random.normal(kv, (B, H, S, D), dtype=jnp.float32)

    # Unmasked path.
    out, score = scale_dot_product_attention(q, k, v)
    jax.block_until_ready((out, score))
    ref_out, ref_score = _reference(q, k, v)
    # Tolerance covers MXU matmul precision differences vs. the XLA einsum.
    assert jnp.allclose(out, ref_out, atol=2e-3, rtol=2e-3), "out mismatch"
    assert jnp.allclose(score, ref_score, atol=2e-3, rtol=2e-3), "score mismatch"
    assert jnp.allclose(jnp.sum(score, axis=-1), 1.0, atol=1e-5), "rows must sum to 1"

    # Masked (causal) path — shared (S, S) int8 mask, one resident tile.
    causal = jnp.tril(jnp.ones((S, S), dtype=jnp.int32))
    out_m, score_m = scale_dot_product_attention(q, k, v, causal)
    jax.block_until_ready((out_m, score_m))
    ref_out_m, ref_score_m = _reference(q, k, v, causal)
    assert jnp.allclose(out_m, ref_out_m, atol=2e-3, rtol=2e-3), "masked out mismatch"
    assert jnp.allclose(score_m, ref_score_m, atol=2e-3, rtol=2e-3), "masked score mismatch"

    print("KERNEL_OK")
</pallas_src>

<mosaic_0001>
module attributes {stable_mosaic.version = 11 : i64} {
  func.func @_sdpa_kernel(%arg0: i32, %arg1: i32, %arg2: memref<8x8x32xf32, #tpu.memory_space<vmem>>, %arg3: memref<8x8x32xf32, #tpu.memory_space<vmem>>, %arg4: memref<8x8x32xf32, #tpu.memory_space<vmem>>, %arg5: memref<8x8x32xf32, #tpu.memory_space<vmem>>, %arg6: memref<8x8x8xf32, #tpu.memory_space<vmem>>) attributes {dimension_semantics = [#tpu.dimension_semantics<parallel>, #tpu.dimension_semantics<parallel>], iteration_bounds = array<i64: 1, 1>, scalar_prefetch = 0 : i64, scratch_operands = 0 : i64, tpu.core_type = #tpu.core_type<tc>, window_params = [{transform_indices = @transform_0, window_bounds = array<i64: 8, 8, 32>}, {transform_indices = @transform_1, window_bounds = array<i64: 8, 8, 32>}, {transform_indices = @transform_2, window_bounds = array<i64: 8, 8, 32>}, {transform_indices = @transform_3, window_bounds = array<i64: 8, 8, 32>}, {transform_indices = @transform_4, window_bounds = array<i64: 8, 8, 8>}]} {
    %c0 = arith.constant 0 : index
    %c0_0 = arith.constant 0 : index
    %c0_1 = arith.constant 0 : index
    %0 = vector.load %arg2[%c0, %c0_0, %c0_1] : memref<8x8x32xf32, #tpu.memory_space<vmem>>, vector<8x8x32xf32>
    %cst = arith.constant 0.176776692 : f32
    %1 = vector.broadcast %cst : f32 to vector<8x8x32xf32>
    %2 = arith.mulf %0, %1 : vector<8x8x32xf32>
    %c0_2 = arith.constant 0 : index
    %c0_3 = arith.constant 0 : index
    %c0_4 = arith.constant 0 : index
    %3 = vector.load %arg3[%c0_2, %c0_3, %c0_4] : memref<8x8x32xf32, #tpu.memory_space<vmem>>, vector<8x8x32xf32>
    %cst_5 = arith.constant dense<0.000000e+00> : vector<8x8x8xf32>
    %4 = tpu.matmul %2, %3, %cst_5 {dimension_numbers = #tpu.dot_dimension_numbers<[2], [2], [1], [1], [0, 0, 0, 1, 1, 1], [0], [0]>} : vector<8x8x32xf32>, vector<8x8x32xf32>, vector<8x8x8xf32> -> vector<8x8x8xf32>
    %cst_6 = arith.constant dense<0xFF800000> : vector<8x8xf32>
    %5 = vector.multi_reduction <maximumf>, %4, %cst_6 [2] : vector<8x8x8xf32> to vector<8x8xf32>
    %6 = vector.shape_cast %5 : vector<8x8xf32> to vector<8x8x1xf32>
    %7 = vector.broadcast %6 : vector<8x8x1xf32> to vector<8x8x8xf32>
    %8 = arith.subf %4, %7 : vector<8x8x8xf32>
    %9 = math.exp %8 : vector<8x8x8xf32>
    %cst_7 = arith.constant dense<0.000000e+00> : vector<8x8xf32>
    %10 = vector.multi_reduction <add>, %9, %cst_7 [2] : vector<8x8x8xf32> to vector<8x8xf32>
    %11 = vector.shape_cast %10 : vector<8x8xf32> to vector<8x8x1xf32>
    %cst_8 = arith.constant 1.000000e+00 : f32
    %12 = vector.broadcast %cst_8 : f32 to vector<8x8x1xf32>
    %13 = arith.divf %12, %11 : vector<8x8x1xf32>
    %14 = vector.broadcast %13 : vector<8x8x1xf32> to vector<8x8x8xf32>
    %15 = arith.mulf %9, %14 : vector<8x8x8xf32>
    %c0_9 = arith.constant 0 : index
    %c0_10 = arith.constant 0 : index
    %c0_11 = arith.constant 0 : index
    %16 = vector.load %arg4[%c0_9, %c0_10, %c0_11] : memref<8x8x32xf32, #tpu.memory_space<vmem>>, vector<8x8x32xf32>
    %cst_12 = arith.constant dense<0.000000e+00> : vector<8x8x32xf32>
    %17 = tpu.matmul %15, %16, %cst_12 {dimension_numbers = #tpu.dot_dimension_numbers<[2], [1], [1], [2], [0, 0, 0, 1, 1, 2], [0], [0]>} : vector<8x8x8xf32>, vector<8x8x32xf32>, vector<8x8x32xf32> -> vector<8x8x32xf32>
    %c0_13 = arith.constant 0 : index
    %c0_14 = arith.constant 0 : index
    %c0_15 = arith.constant 0 : index
    %18 = vector.load %arg6[%c0_13, %c0_14, %c0_15] : memref<8x8x8xf32, #tpu.memory_space<vmem>>, vector<8x8x8xf32>
    tpu.vector_store %arg6[%c0_13, %c0_14, %c0_15], %15 {strides = array<i32>} : memref<8x8x8xf32, #tpu.memory_space<vmem>>, vector<8x8x8xf32>,
    %c0_16 = arith.constant 0 : index
    %c0_17 = arith.constant 0 : index
    %c0_18 = arith.constant 0 : index
    %19 = vector.load %arg5[%c0_16, %c0_17, %c0_18] : memref<8x8x32xf32, #tpu.memory_space<vmem>>, vector<8x8x32xf32>
    tpu.vector_store %arg5[%c0_16, %c0_17, %c0_18], %17 {strides = array<i32>} : memref<8x8x32xf32, #tpu.memory_space<vmem>>, vector<8x8x32xf32>,
    return
  }
  func.func @transform_0(%arg0: i32, %arg1: i32) -> (i32, i32, i32) {
    %c0_i32 = arith.constant 0 : i32
    %c0_i32_0 = arith.constant 0 : i32
    return %arg0, %arg1, %c0_i32 : i32, i32, i32
  }
  func.func @transform_1(%arg0: i32, %arg1: i32) -> (i32, i32, i32) {
    %c0_i32 = arith.constant 0 : i32
    %c0_i32_0 = arith.constant 0 : i32
    %c0_i32_1 = arith.constant 0 : i32
    return %arg0, %c0_i32, %c0_i32_0 : i32, i32, i32
  }
  func.func @transform_2(%arg0: i32, %arg1: i32) -> (i32, i32, i32) {
    %c0_i32 = arith.constant 0 : i32
    %c0_i32_0 = arith.constant 0 : i32
    %c0_i32_1 = arith.constant 0 : i32
    return %arg0, %c0_i32, %c0_i32_0 : i32, i32, i32
  }
  func.func @transform_3(%arg0: i32, %arg1: i32) -> (i32, i32, i32) {
    %c0_i32 = arith.constant 0 : i32
    %c0_i32_0 = arith.constant 0 : i32
    return %arg0, %arg1, %c0_i32 : i32, i32, i32
  }
  func.func @transform_4(%arg0: i32, %arg1: i32) -> (i32, i32, i32) {
    %c0_i32 = arith.constant 0 : i32
    %c0_i32_0 = arith.constant 0 : i32
    return %arg0, %arg1, %c0_i32 : i32, i32, i32
  }
}

</mosaic_0001>

<bundles_post_ra>
// kernel: scale_dot_product_attention.1
= control target key start
LH: loop header
LB: loop body
LE: loop exit
PB: predicated region body
PF: predicated region fallthrough
CT: control target
= control target key end

     0   :  { %10 = vsyncpa [#allocation3], 0  ;;  %s1145_s0 = inlined_call_operand.hbm [shape: f32[8,8,32], index: 0, kind: input, shape index: {}]   ;;  %s1146_s1 = inlined_call_operand.hbm [shape: f32[8,8,32], index: 1, kind: input, shape index: {}]   ;;  %s1147_s2 = inlined_call_operand.hbm [shape: f32[8,8,32], index: 2, kind: input, shape index: {}]   ;;  %s1148_s3 = inlined_call_operand.hbm [shape: f32[8,8,32], index: 3, kind: output, shape index: {0}]   ;;  %s1149_s4 = inlined_call_operand.hbm [shape: f32[8,8,8], index: 4, kind: output, shape index: {1}]  }
   0x1   :  { %11 = vsyncpa [#allocation6], 0 }
   0x2   :  { %12 = vsyncpa [#allocation4], 0 }
   0x3   :  { %13 = vsyncpa [#allocation10], 0  ;;  %s31_s17 = sshll.u32 %s1146_s1, 4  ;;  %s936_s18 = smov [#allocation5]   ;;  %s32_s17 = int_to_ptr.hbm [resolvable:$true] %s31_s17 }
   0x4   :  { %s33_s19 = sshll.u32 %s936_s18, 4  ;;  %s18_s22 = sshll.u32 %s1145_s0, 4  ;;  %s34_s19 = int_to_ptr.vmem [resolvable:$true] %s33_s19  ;;  %s19_s22 = int_to_ptr.hbm [resolvable:$true] %s18_s22 }
   0x5   :  { %s937_s23 = smov 128   ;;  %s938_s24 = smov 8  }
   0x6   :  { %39 = dma.hbm_to_vmem [thread:$0]  %s32_s17, 1024, %s34_s19, [#allocation6], %s937_s23, %s937_s23, %s938_s24  }
   0x7   :  { %s939_s25 = smov [#allocation2]   ;;  %s44_s1 = sshll.u32 %s1147_s2, 4  ;;  %s45_s1 = int_to_ptr.hbm [resolvable:$true] %s44_s1 }
   0x8   :  { %s20_s26 = sshll.u32 %s939_s25, 4  ;;  %s940_s0 = smov [#allocation7]   ;;  %s21_s26 = int_to_ptr.vmem [resolvable:$true] %s20_s26 }
   0x9   :  { %26 = dma.hbm_to_vmem [thread:$0]  %s19_s22, 1024, %s21_s26, [#allocation3], %s937_s23, %s937_s23, %s938_s24  }
   0xa   :  { %s46_s29 = sshll.u32 %s940_s0, 4  ;;  %s47_s29 = int_to_ptr.vmem [resolvable:$true] %s46_s29 }
   0xb   :  { %52 = dma.hbm_to_vmem [thread:$0]  %s45_s1, 1024, %s47_s29, [#allocation6], %s937_s23, %s937_s23, %s938_s24  }
   0xc   :  { %928 = dma.done.wait [#allocation3], 1024  }
   0xd   :  { %929 = vsyncadd [#allocation3], 4294966272 }
   0xe   :  { %930 = dma.done.wait [#allocation6], 2048  }
   0xf   :  { %931 = vsyncadd [#allocation6], 4294965248  ;;  %vm89_vm0 = vcmask 261120   ;;  %v81_v0 = vld [vmem:[#allocation5] sm:$0xff]  ;;  %v83_v1 = vld [vmem:[#allocation5 + $0x10] sm:$0xff]  ;;  %vm298_vm1 = vcmask 64512  }
  0x10   :  { %v65_v2 = vld [vmem:[#allocation2] sm:$0xff]  ;;  %745 = vmatpush.xpose.msk.msra.mxu0 %vm89_vm0, %v81_v0  ;;  %749 = vmatpush.xpose.msk.msra.mxu2 %vm89_vm0, %v83_v1  ;;  %v67_v4 = vld [vmem:[#allocation2 + $0x10] sm:$0xff]  ;;  %v82_v6 = vld [vmem:[#allocation5 + $0x8] sm:$0xff]  ;;  %s941_s2 = smov [#allocation9]   ;;  %s726_s7 = sshll.u32 %s1149_s4, 4  ;;  %s727_s7 = int_to_ptr.hbm [resolvable:$true] %s726_s7 }
  0x11   :  { %v73_v3 = vmul.f32 0.17677669, %v65_v2  ;;  %v87_v5 = vld [vmem:[#allocation5 + $0x30] sm:$0xff]  ;;  %v75_v7 = vmul.f32 0.17677669, %v67_v4  ;;  %747 = vmatpush.xpose.msk.msra.mxu1 %vm89_vm0, %v82_v6  ;;  %v84_v8 = vld [vmem:[#allocation5 + $0x18] sm:$0xff] }
  0x12   :  { %v66_v9 = vld [vmem:[#allocation2 + $0x8] sm:$0xff]  ;;  %v68_v10 = vld [vmem:[#allocation2 + $0x18] sm:$0xff]  ;;  %751 = vmatpush.xpose.msk.msra.mxu3 %vm89_vm0, %v84_v8  ;;  %v71_v15 = vld [vmem:[#allocation2 + $0x30] sm:$0xff]  ;;  %s724_s30 = sshll.u32 %s941_s2, 4  ;;  %s942_s4 = smov [#allocation8]   ;;  %s725_s30 = int_to_ptr.vmem [resolvable:$true] %s724_s30 }
  0x13   :  { %v74_v11 = vmul.f32 0.17677669, %v66_v9  ;;  %v76_v12 = vmul.f32 0.17677669, %v68_v10  ;;  %v88_v13 = vld [vmem:[#allocation5 + $0x38] sm:$0xff]  ;;  %746 = vmatmul.msk.f32.vlgmr.msra.gmra.mxu0 %vm89_vm0, %v73_v3  ;;  %750 = vmatmul.msk.f32.vlgmr.msra.gmra.mxu2 %vm89_vm0, %v75_v7  ;;  %v86_v14 = vld [vmem:[#allocation5 + $0x28] sm:$0xff] }
  0x14   :  { %757 = vmatpush.xpose.msk.msrb.mxu2 %vm89_vm0, %v87_v5  ;;  %v85_v16 = vld [vmem:[#allocation5 + $0x20] sm:$0xff]  ;;  %v70_v18 = vld [vmem:[#allocation2 + $0x28] sm:$0xff]  ;;  %v72_v19 = vld [vmem:[#allocation2 + $0x38] sm:$0xff]  ;;  %v79_v20 = vmul.f32 0.17677669, %v71_v15  ;;  %s711_s8 = sshll.u32 %s942_s4, 4  ;;  %s712_s8 = int_to_ptr.vmem [resolvable:$true] %s711_s8 }
  0x15   :  { %748 = vmatmul.msk.f32.vlgmr.msra.gmra.mxu1 %vm89_vm0, %v74_v11  ;;  %v69_v17 = vld [vmem:[#allocation2 + $0x20] sm:$0xff]  ;;  %752 = vmatmul.msk.f32.vlgmr.msra.gmra.mxu3 %vm89_vm0, %v76_v12  ;;  %v78_v22 = vmul.f32 0.17677669, %v70_v18  ;;  %v80_v23 = vmul.f32 0.17677669, %v72_v19  ;;  %s713_s11 = sshll.u32 %s1148_s3, 4  ;;  %s714_s11 = int_to_ptr.hbm [resolvable:$true] %s713_s11 }
  0x16   :  { %759 = vmatpush.xpose.msk.msrb.mxu3 %vm89_vm0, %v88_v13  ;;  %755 = vmatpush.xpose.msk.msrb.mxu1 %vm89_vm0, %v86_v14  ;;  %v77_v21 = vmul.f32 0.17677669, %v69_v17  ;;  %v501_v17 = vld [vmem:[#allocation7 + $0x10] sm:$0xff] }
  0x17   :  { %753 = vmatpush.xpose.msk.msrb.mxu0 %vm89_vm0, %v85_v16  ;;  %v499_v16 = vld [vmem:[#allocation7] sm:$0xff] }
  0x18   :  { %571 = vmatpush.msra.mxu2 %v501_v17 }
  0x1b   :  { %758 = vmatmul.msk.f32.vlgmr.msrb.gmra.mxu2 %vm89_vm0, %v79_v20  ;;  %754 = vmatmul.msk.f32.vlgmr.msrb.gmra.mxu0 %vm89_vm0, %v77_v21  ;;  %v502_v20 = vld [vmem:[#allocation7 + $0x18] sm:$0xff]  ;;  %v500_v21 = vld [vmem:[#allocation7 + $0x8] sm:$0xff] }
  0x1c   :  { %525 = vmatpush.msra.mxu0 %v499_v16  ;;  %594 = vmatpush.msra.mxu3 %v502_v20 }
  0x1d   :  { %756 = vmatmul.msk.f32.vlgmr.msrb.gmra.mxu1 %vm89_vm0, %v78_v22  ;;  %760 = vmatmul.msk.f32.vlgmr.msrb.gmra.mxu3 %vm89_vm0, %v80_v23 }
  0x1e   :  { %548 = vmatpush.msra.mxu1 %v500_v21 }
  0x90   :  { %v113_v24 = vpop.f32.mrf.mxu0 }
  0x91   :  { %v299_v25 = vsel %vm298_vm1, %v113_v24, -inf }
  0x92   :  { %300 = vmax.xlane.f32.xlu1 %v299_v25  ;;  %v139_v26 = vpop.f32.mrf.mxu1 }
  0x93   :  { %v302_v29 = vsel %vm298_vm1, %v139_v26, -inf }
  0x96   :  { %v165_v27 = vpop.f32.mrf.mxu2 }
  0x97   :  { %v305_v28 = vsel %vm298_vm1, %v165_v27, -inf }
  0x98   :  { %306 = vmax.xlane.f32.xlu0 %v305_v28  ;;  %v191_v30 = vpop.f32.mrf.mxu3  ;;  %v217_v36 = vpop.f32.mrf.mxu0 }
  0x99   :  { %v308_v32 = vsel %vm298_vm1, %v191_v30, -inf  ;;  %v311_v39 = vsel %vm298_vm1, %v217_v36, -inf }
  0x9a   :  { %303 = vmax.xlane.f32.xlu1 %v302_v29  ;;  %v243_v31 = vpop.f32.mrf.mxu1 }
  0x9b   :  { %v314_v35 = vsel %vm298_vm1, %v243_v31, -inf }
  0x9e   :  { %v269_v33 = vpop.f32.mrf.mxu2 }
  0x9f   :  { %v317_v34 = vsel %vm298_vm1, %v269_v33, -inf }
  0xa0   :  { %309 = vmax.xlane.f32.xlu0 %v308_v32  ;;  %318 = vmax.xlane.f32.xlu2 %v317_v34  ;;  %v295_v37 = vpop.f32.mrf.mxu3  ;;  %v506_v34 = vld [vmem:[#allocation7 + $0x38] sm:$0xff] }
  0xa1   :  { %v320_v38 = vsel %vm298_vm1, %v295_v37, -inf  ;;  %686 = vmatpush.msrb.mxu3 %v506_v34 }
  0xa2   :  { %315 = vmax.xlane.f32.xlu1 %v314_v35  ;;  %v503_v35 = vld [vmem:[#allocation7 + $0x20] sm:$0xff] }
  0xa3   :  { %617 = vmatpush.msrb.mxu0 %v503_v35 }
  0xa8   :  { %321 = vmax.xlane.f32.xlu2 %v320_v38  ;;  %312 = vmax.xlane.f32.xlu0 %v311_v39 }
 0x105   :  { %v301_v40 = vpop.xlane.xlu1 %300 }
 0x106   :  { %v323_v41 = vsub.f32 %v113_v24, %v301_v40 }
 0x108   :  { %v331_v42 = vmul.f32 1.442695, %v323_v41 }
 0x10a   :  { %776 = vpow2.f32 %v331_v42  ;;  %v504_v42 = vld [vmem:[#allocation7 + $0x28] sm:$0xff] }
 0x10b   :  { %v307_v43 = vpop.xlane.xlu0 %306  ;;  %640 = vmatpush.msrb.mxu1 %v504_v42 }
 0x10c   :  { %v325_v44 = vsub.f32 %v165_v27, %v307_v43 }
 0x10d   :  { %v304_v45 = vpop.xlane.xlu1 %303 }
 0x10e   :  { %v335_v46 = vmul.f32 1.442695, %v325_v44  ;;  %v324_v47 = vsub.f32 %v139_v26, %v304_v45 }
 0x110   :  { %v1010_v48 = vpop.eup %776  ;;  %778 = vpow2.f32 %v335_v46  ;;  %v333_v50 = vmul.f32 1.442695, %v324_v47 }
 0x111   :  { %v347_v49 = vsel %vm298_vm1, %v1010_v48, 0.0 }
 0x112   :  { %348 = vadd.xlane.f32.xlu1 %v347_v49  ;;  %780 = vpow2.f32 %v333_v50 }
 0x113   :  { %v310_v51 = vpop.xlane.xlu0 %309  ;;  %v319_v52 = vpop.xlane.xlu2 %318 }
 0x114   :  { %v326_v53 = vsub.f32 %v191_v30, %v310_v51  ;;  %v329_v56 = vsub.f32 %v269_v33, %v319_v52  ;;  %v505_v33 = vld [vmem:[#allocation7 + $0x30] sm:$0xff] }
 0x115   :  { %v316_v59 = vpop.xlane.xlu1 %315  ;;  %663 = vmatpush.msrb.mxu2 %v505_v33 }
 0x116   :  { %v1014_v54 = vpop.eup %778  ;;  %v337_v55 = vmul.f32 1.442695, %v326_v53  ;;  %v343_v58 = vmul.f32 1.442695, %v329_v56  ;;  %v328_v2 = vsub.f32 %v243_v31, %v316_v59 }
 0x117   :  { %v353_v57 = vsel %vm298_vm1, %v1014_v54, 0.0 }
 0x118   :  { %782 = vpow2.f32 %v337_v55  ;;  %354 = vadd.xlane.f32.xlu2 %v353_v57  ;;  %v1018_v62 = vpop.eup %780  ;;  %v341_v7 = vmul.f32 1.442695, %v328_v2 }
 0x119   :  { %784 = vpow2.f32 %v343_v58  ;;  %v350_v5 = vsel %vm298_vm1, %v1018_v62, 0.0 }
 0x11b   :  { %v322_v60 = vpop.xlane.xlu2 %321  ;;  %v313_v61 = vpop.xlane.xlu0 %312 }
 0x11c   :  { %v330_v63 = vsub.f32 %v295_v37, %v322_v60  ;;  %v327_v0 = vsub.f32 %v217_v36, %v313_v61 }
 0x11e   :  { %v1020_v1 = vpop.eup %782  ;;  %v345_v3 = vmul.f32 1.442695, %v330_v63  ;;  %v339_v4 = vmul.f32 1.442695, %v327_v0 }
 0x11f   :  { %v356_v6 = vsel %vm298_vm1, %v1020_v1, 0.0  ;;  %v1026_v8 = vpop.eup %784 }
 0x120   :  { %786 = vpow2.f32 %v345_v3  ;;  %351 = vadd.xlane.f32.xlu2 %v350_v5  ;;  %357 = vadd.xlane.f32.xlu0 %v356_v6  ;;  %v365_v12 = vsel %vm298_vm1, %v1026_v8, 0.0 }
 0x121   :  { %788 = vpow2.f32 %v339_v4 }
 0x122   :  { %790 = vpow2.f32 %v341_v7 }
 0x126   :  { %v1028_v9 = vpop.eup %786 }
 0x127   :  { %v1030_v10 = vpop.eup %788  ;;  %v368_v11 = vsel %vm298_vm1, %v1028_v9, 0.0 }
 0x128   :  { %369 = vadd.xlane.f32.xlu1 %v368_v11  ;;  %366 = vadd.xlane.f32.xlu0 %v365_v12  ;;  %v359_v13 = vsel %vm298_vm1, %v1030_v10, 0.0  ;;  %v1038_v14 = vpop.eup %790 }
 0x129   :  { %360 = vadd.xlane.f32.xlu2 %v359_v13  ;;  %v362_v15 = vsel %vm298_vm1, %v1038_v14, 0.0 }
 0x130   :  { %363 = vadd.xlane.f32.xlu0 %v362_v15 }
 0x185   :  { %v349_v18 = vpop.xlane.xlu1 %348 }
 0x186   :  { %792 = vrcp.f32 %v349_v18  ;;  %v382_v25 = vand.u32 2147483648, %v349_v18  ;;  %v380_v27 = vand.u32 2147483647, %v349_v18  ;;  %vm376_vm3 = vweird.f32 %v349_v18 }
 0x188   :  { %v383_v36 = vor.u32 1.1754944e-38, %v382_v25  ;;  %vm381_vm5 = vcmp.eq.f32.partialorder %v380_v27, 8.507059e+37 }
 0x18b   :  { %v355_v19 = vpop.xlane.xlu2 %354 }
 0x18c   :  { %v793_v22 = vpop.eup %792  ;;  %794 = vrcp.f32 %v355_v19  ;;  %v410_v44 = vand.u32 2147483647, %v355_v19  ;;  %v412_v45 = vand.u32 2147483648, %v355_v19  ;;  %vm406_vm7 = vweird.f32 %v355_v19 }
 0x18d   :  { %v372_v23 = vmul.f32 %v793_v22, %v349_v18  ;;  %vm377_vm2 = vweird.f32 %v793_v22 }
 0x18e   :  { %vm378_vm4 = vmor %vm376_vm3, %vm377_vm2  ;;  %vm411_vm9 = vcmp.eq.f32.partialorder %v410_v44, 8.507059e+37  ;;  %v413_v56 = vor.u32 1.1754944e-38, %v412_v45 }
 0x18f   :  { %v373_v24 = vsub.f32 1.0, %v372_v23 }
 0x191   :  { %v374_v26 = vmul.f32 %v793_v22, %v373_v24 }
 0x192   :  { %v795_v28 = vpop.eup %794 }
 0x193   :  { %v375_v29 = vadd.f32 %v793_v22, %v374_v26  ;;  %v402_v30 = vmul.f32 %v795_v28, %v355_v19  ;;  %v352_v31 = vpop.xlane.xlu2 %351  ;;  %v1042_v32 = vpop.xlane.xlu0 %357  ;;  %vm407_vm6 = vweird.f32 %v795_v28 }
 0x194   :  { %796 = vrcp.f32 %v352_v31  ;;  %vm1048_vm8 = vmor %vm406_vm7, %vm407_vm6  ;;  %v395_v58 = vand.u32 2147483647, %v352_v31  ;;  %v397_v59 = vand.u32 2147483648, %v352_v31  ;;  %v425_v61 = vand.u32 2147483647, %v1042_v32 }
 0x195   :  { %v379_v37 = vsel %vm378_vm4, %v793_v22, %v375_v29  ;;  %v403_v38 = vsub.f32 1.0, %v402_v30  ;;  %798 = vrcp.f32 %v1042_v32  ;;  %v427_v2 = vand.u32 2147483648, %v1042_v32 }
 0x196   :  { %v384_v39 = vsel %vm381_vm5, %v383_v36, %v379_v37  ;;  %vm391_vm12 = vweird.f32 %v352_v31  ;;  %vm421_vm13 = vweird.f32 %v1042_v32  ;;  %vm396_vm15 = vcmp.eq.f32.partialorder %v395_v58, 8.507059e+37 }
 0x197   :  { %v404_v40 = vmul.f32 %v795_v28, %v403_v38  ;;  %v491_v41 = vmul.f32 %v1010_v48, %v384_v39  ;;  %v398_v6 = vor.u32 1.1754944e-38, %v397_v59  ;;  %vm426_vm3 = vcmp.eq.f32.partialorder %v425_v61, 8.507059e+37 }
 0x198   :  { %v428_v13 = vor.u32 1.1754944e-38, %v427_v2 }
 0x199   :  { %v405_v43 = vadd.f32 %v795_v28, %v404_v40  ;;  %761 = vmatmul.msk.f32.vlgmr.msra.gmra.mxu0 %vm298_vm1, %v491_v41  ;;  %691 = vst.msk [vmem:[#allocation9] sm:$0xff] %vm298_vm1, %v491_v41 }
 0x19a   :  { %v797_v46 = vpop.eup %796 }
 0x19b   :  { %v799_v47 = vpop.eup %798  ;;  %v387_v50 = vmul.f32 %v797_v46, %v352_v31  ;;  %v1052_v51 = vpop.xlane.xlu1 %369  ;;  %v409_v52 = vsel %vm1048_vm8, %v795_v28, %v405_v43  ;;  %vm392_vm10 = vweird.f32 %v797_v46 }
 0x19c   :  { %v1054_v48 = vpop.xlane.xlu0 %366  ;;  %v417_v53 = vmul.f32 %v799_v47, %v1042_v32  ;;  %800 = vrcp.f32 %v1052_v51  ;;  %v1060_v55 = vpop.xlane.xlu2 %360  ;;  %v414_v63 = vsel %vm411_vm9, %v413_v56, %v409_v52  ;;  %vm422_vm11 = vweird.f32 %v799_v47  ;;  %vm393_vm14 = vmor %vm391_vm12, %vm392_vm10 }
 0x19d   :  { %v388_v57 = vsub.f32 1.0, %v387_v50  ;;  %802 = vrcp.f32 %v1060_v55  ;;  %v493_v11 = vmul.f32 %v1014_v54, %v414_v63  ;;  %vm423_vm2 = vmor %vm421_vm13, %vm422_vm11  ;;  %v485_v20 = vand.u32 2147483647, %v1052_v51 }
 0x19e   :  { %v418_v60 = vsub.f32 1.0, %v417_v53  ;;  %804 = vrcp.f32 %v1054_v48  ;;  %vm481_vm4 = vweird.f32 %v1052_v51  ;;  %v487_v24 = vand.u32 2147483648, %v1052_v51 }
 0x19f   :  { %v389_v0 = vmul.f32 %v797_v46, %v388_v57  ;;  %763 = vmatmul.msk.f32.vlgmr.msra.gmra.mxu2 %vm298_vm1, %v493_v11  ;;  %693 = vst.msk [vmem:[#allocation9 + $0x10] sm:$0xff] %vm298_vm1, %v493_v11  ;;  %vm436_vm5 = vweird.f32 %v1060_v55  ;;  %v440_v25 = vand.u32 2147483647, %v1060_v55  ;;  %vm1082_vm7 = vcmp.eq.f32.partialorder %v485_v20, 8.507059e+37 }
 0x1a0   :  { %v419_v3 = vmul.f32 %v799_v47, %v418_v60  ;;  %v442_v31 = vand.u32 2147483648, %v1060_v55  ;;  %v470_v32 = vand.u32 2147483647, %v1054_v48  ;;  %v488_v37 = vor.u32 1.1754944e-38, %v487_v24 }
 0x1a1   :  { %v390_v4 = vadd.f32 %v797_v46, %v389_v0  ;;  %vm1093_vm10 = vcmp.eq.f32.partialorder %v440_v25, 8.507059e+37  ;;  %v472_v39 = vand.u32 2147483648, %v1054_v48  ;;  %vm466_vm13 = vweird.f32 %v1054_v48 }
 0x1a2   :  { %v801_v5 = vpop.eup %800  ;;  %v420_v7 = vadd.f32 %v799_v47, %v419_v3  ;;  %v443_v44 = vor.u32 1.1754944e-38, %v442_v31 }
 0x1a3   :  { %v394_v12 = vsel %vm393_vm14, %v797_v46, %v390_v4  ;;  %v477_v15 = vmul.f32 %v801_v5, %v1052_v51  ;;  %v803_v17 = vpop.eup %802  ;;  %vm482_vm6 = vweird.f32 %v801_v5  ;;  %vm471_vm14 = vcmp.eq.f32.partialorder %v470_v32, 8.507059e+37 }
 0x1a4   :  { %v1069_v16 = vpop.xlane.xlu0 %363  ;;  %v399_v18 = vsel %vm396_vm15, %v398_v6, %v394_v12  ;;  %v424_v19 = vsel %vm423_vm2, %v799_v47, %v420_v7  ;;  %v432_v22 = vmul.f32 %v803_v17, %v1060_v55  ;;  %v805_v23 = vpop.eup %804  ;;  %vm437_vm8 = vweird.f32 %v803_v17  ;;  %vm483_vm9 = vmor %vm481_vm4, %vm482_vm6 }
 0x1a5   :  { %806 = vrcp.f32 %v1069_v16  ;;  %v429_v54 = vsel %vm426_vm3, %v428_v13, %v424_v19  ;;  %v478_v21 = vsub.f32 1.0, %v477_v15  ;;  %v492_v26 = vmul.f32 %v1018_v62, %v399_v18  ;;  %vm438_vm12 = vmor %vm436_vm5, %vm437_vm8 }
 0x1a6   :  { %v433_v28 = vsub.f32 1.0, %v432_v22  ;;  %v462_v29 = vmul.f32 %v805_v23, %v1054_v48  ;;  %v494_v33 = vmul.f32 %v1020_v1, %v429_v54  ;;  %vm467_vm11 = vweird.f32 %v805_v23 }
 0x1a7   :  { %v479_v27 = vmul.f32 %v801_v5, %v478_v21  ;;  %762 = vmatmul.msk.f32.vlgmr.msra.gmra.mxu1 %vm298_vm1, %v492_v26  ;;  %692 = vst.msk [vmem:[#allocation9 + $0x8] sm:$0xff] %vm298_vm1, %v492_v26  ;;  %vm468_vm15 = vmor %vm466_vm13, %vm467_vm11  ;;  %v473_v51 = vor.u32 1.1754944e-38, %v472_v39  ;;  %v455_v52 = vand.u32 2147483647, %v1069_v16  ;;  %v457_v53 = vand.u32 2147483648, %v1069_v16 }
 0x1a8   :  { %v434_v34 = vmul.f32 %v803_v17, %v433_v28  ;;  %v463_v35 = vsub.f32 1.0, %v462_v29  ;;  %764 = vmatmul.msk.f32.vlgmr.msra.gmra.mxu3 %vm298_vm1, %v494_v33  ;;  %694 = vst.msk [vmem:[#allocation9 + $0x18] sm:$0xff] %vm298_vm1, %v494_v33  ;;  %vm451_vm3 = vweird.f32 %v1069_v16 }
 0x1a9   :  { %v480_v62 = vadd.f32 %v801_v5, %v479_v27  ;;  %v458_v59 = vor.u32 1.1754944e-38, %v457_v53  ;;  %vm456_vm5 = vcmp.eq.f32.partialorder %v455_v52, 8.507059e+37 }
 0x1aa   :  { %v435_v40 = vadd.f32 %v803_v17, %v434_v34  ;;  %v464_v41 = vmul.f32 %v805_v23, %v463_v35 }
 0x1ab   :  { %v807_v36 = vpop.eup %806  ;;  %v484_v1 = vsel %vm483_vm9, %v801_v5, %v480_v62 }
 0x1ac   :  { %v447_v42 = vmul.f32 %v807_v36, %v1069_v16  ;;  %v489_v43 = vsel %vm1082_vm7, %v488_v37, %v484_v1  ;;  %v439_v46 = vsel %vm438_vm12, %v803_v17, %v435_v40  ;;  %v465_v47 = vadd.f32 %v805_v23, %v464_v41 }
 0x1ad   :  { %v498_v45 = vmul.f32 %v1028_v9, %v489_v43  ;;  %v444_v50 = vsel %vm1093_vm10, %v443_v44, %v439_v46  ;;  %vm452_vm2 = vweird.f32 %v807_v36 }
 0x1ae   :  { %v448_v49 = vsub.f32 1.0, %v447_v42  ;;  %v495_v48 = vmul.f32 %v1030_v10, %v444_v50  ;;  %v469_v55 = vsel %vm468_vm15, %v805_v23, %v465_v47  ;;  %vm453_vm4 = vmor %vm451_vm3, %vm452_vm2 }
 0x1af   :  { %698 = vst.msk [vmem:[#allocation9 + $0x38] sm:$0xff] %vm298_vm1, %v498_v45  ;;  %v474_v9 = vsel %vm471_vm14, %v473_v51, %v469_v55 }
 0x1b0   :  { %v449_v56 = vmul.f32 %v807_v36, %v448_v49  ;;  %695 = vst.msk [vmem:[#allocation9 + $0x20] sm:$0xff] %vm298_vm1, %v495_v48  ;;  %765 = vmatmul.msk.f32.vlgmr.msrb.gmra.mxu0 %vm298_vm1, %v495_v48  ;;  %v497_v58 = vmul.f32 %v1026_v8, %v474_v9  ;;  %768 = vmatmul.msk.f32.vlgmr.msrb.gmra.mxu3 %vm298_vm1, %v498_v45 }
 0x1b2   :  { %v450_v57 = vadd.f32 %v807_v36, %v449_v56  ;;  %767 = vmatmul.msk.f32.vlgmr.msrb.gmra.mxu2 %vm298_vm1, %v497_v58  ;;  %697 = vst.msk [vmem:[#allocation9 + $0x30] sm:$0xff] %vm298_vm1, %v497_v58 }
 0x1b4   :  { %v454_v60 = vsel %vm453_vm4, %v807_v36, %v450_v57 }
 0x1b5   :  { %v459_v10 = vsel %vm456_vm5, %v458_v59, %v454_v60 }
 0x1b6   :  { %v496_v61 = vmul.f32 %v1038_v14, %v459_v10 }
 0x1b8   :  { %696 = vst.msk [vmem:[#allocation9 + $0x28] sm:$0xff] %vm298_vm1, %v496_v61  ;;  %766 = vmatmul.msk.f32.vlgmr.msrb.gmra.mxu1 %vm298_vm1, %v496_v61 }
 0x1b9   :  { %732 = dma.vmem_to_hbm [thread:$0]  %s725_s30, 1024, %s727_s7, [#allocation10], %s937_s23, %s937_s23, %s938_s24  }
 0x216   :  { %v527_v8 = vpop.f32.mrf.mxu0 }
 0x217   :  { %699 = vst.msk [vmem:[#allocation8] sm:$0xff] %vm89_vm0, %v527_v8 }
 0x222   :  { %v573_v63 = vpop.f32.mrf.mxu2 }
 0x223   :  { %701 = vst.msk [vmem:[#allocation8 + $0x10] sm:$0xff] %vm89_vm0, %v573_v63 }
 0x224   :  { %v550_v14 = vpop.f32.mrf.mxu1 }
 0x225   :  { %700 = vst.msk [vmem:[#allocation8 + $0x8] sm:$0xff] %vm89_vm0, %v550_v14 }
 0x22b   :  { %v596_v0 = vpop.f32.mrf.mxu3 }
 0x22c   :  { %702 = vst.msk [vmem:[#allocation8 + $0x18] sm:$0xff] %vm89_vm0, %v596_v0 }
 0x22d   :  { %v619_v2 = vpop.f32.mrf.mxu0 }
 0x22e   :  { %703 = vst.msk [vmem:[#allocation8 + $0x20] sm:$0xff] %vm89_vm0, %v619_v2 }
 0x233   :  { %v688_v4 = vpop.f32.mrf.mxu3 }
 0x234   :  { %706 = vst.msk [vmem:[#allocation8 + $0x38] sm:$0xff] %vm89_vm0, %v688_v4 }
 0x235   :  { %v642_v3 = vpop.f32.mrf.mxu1  ;;  %v665_v5 = vpop.f32.mrf.mxu2 }
 0x236   :  { %704 = vst.msk [vmem:[#allocation8 + $0x28] sm:$0xff] %vm89_vm0, %v642_v3 }
 0x237   :  { %705 = vst.msk [vmem:[#allocation8 + $0x30] sm:$0xff] %vm89_vm0, %v665_v5 }
 0x238   :  { %719 = dma.vmem_to_hbm [thread:$0]  %s712_s8, 1024, %s714_s11, [#allocation4], %s937_s23, %s937_s23, %s938_s24  }
 0x239   :  { %932 = dma.done.wait [#allocation4], 1024  }
 0x23a   :  { %933 = vsyncadd [#allocation4], 4294966272 }
 0x23b   :  { %934 = dma.done.wait [#allocation10], 1024  }
 0x23c   :  { %935 = vsyncadd [#allocation10], 4294966272 }
 0x23d   :  { %741 = vsyncpa [#allocation3], 1 }
 0x23e   :  { %742 = vsyncpa [#allocation6], 1 }
 0x23f   :  { %743 = vsyncpa [#allocation4], 1 }
 0x240   :  { %744 = vsyncpa [#allocation10], 1 }

</bundles_post_ra>
